<compile_context>
chip_gen: v7x
topology: tpu7x:2x2x1
jax: 0.10.0
libtpu: 0.0.40
codegen_flags: <defaults>
</compile_context>

<pallas_src>
import jax
import jax.numpy as jnp
from jax.experimental import pallas as pl
from jax.experimental.pallas import tpu as pltpu


def _graphconv_kernel(adj_ref, emb_hbm, out_ref, agg_scr, init_sem):
    """One grid step = one (row-tile i, k-tile k) partial product of hop h.

    adj_ref : (T, T) bf16        adjacency tile A[i*T:(i+1)*T, k*T:(k+1)*T]
    emb_hbm : (NT, T, D) bf16    initial embeddings, left in HBM (pl.ANY)
    out_ref : (T, D) f32         output slab for (row tile i, hop h+1); also
                                 the f32 k-reduction accumulator
    agg_scr : (2*NT, T, D) bf16  ping-pong aggregate, VMEM-resident across hops
    init_sem: DMA semaphore for the one-time embedding load
    """
    h = pl.program_id(0)
    i = pl.program_id(1)
    k = pl.program_id(2)
    nk = pl.num_programs(2)
    nt = agg_scr.shape[0] // 2
    src = h % 2

    # One-time init: DMA the embeddings into ping-pong slot 0 (= hop-0 aggregate).
    @pl.when((h == 0) & (i == 0) & (k == 0))
    def _():
        cp = pltpu.make_async_copy(emb_hbm, agg_scr.at[0:nt], init_sem)
        cp.start()
        cp.wait()

    # Zero the f32 accumulator (the resident output block) at the start of the
    # k reduction.
    @pl.when(k == 0)
    def _():
        out_ref[...] = jnp.zeros_like(out_ref)

    # bf16 x bf16 -> f32 accumulate on the MXU.
    out_ref[...] += jnp.dot(adj_ref[...], agg_scr[src * nt + k],
                            preferred_element_type=jnp.float32)

    # End of the k reduction: row tile i of hop h+1 is done; feed the next hop.
    @pl.when(k == nk - 1)
    def _():
        agg_scr[(1 - src) * nt + i] = out_ref[...].astype(agg_scr.dtype)


def graph_conv_forward(user_embed, item_embed, interact_mat, n_hops, *, tile=512):
    """Pure-JAX wrapper: concat -> padded/tiled Pallas propagation -> split."""
    all_embed = jnp.concatenate([user_embed, item_embed], axis=0).astype(jnp.float32)
    N, D = all_embed.shape
    n_users = user_embed.shape[0]

    if n_hops == 0:  # degenerate case: just the stacked input embeddings
        embs = all_embed[:, None, :]
        return embs[:n_users], embs[n_users:]

    d_pad = ((D + 127) // 128) * 128
    # Tile must be lane-aligned (multiple of 128); clamp so tiny graphs become
    # a single tile instead of being padded up to `tile`.
    T = max(128, (int(tile) // 128) * 128)
    T = min(T, ((N + 127) // 128) * 128)
    n_pad = ((N + T - 1) // T) * T
    nt = n_pad // T

    # Pad to tile-friendly sizes. Zero rows/cols contribute nothing to the
    # propagation and are sliced off at the end.
    emb_p = jnp.zeros((n_pad, d_pad), jnp.float32).at[:N, :D].set(all_embed)
    emb_bf16 = emb_p.astype(jnp.bfloat16).reshape(nt, T, d_pad)
    adj_p = jnp.zeros((n_pad, n_pad), jnp.bfloat16).at[:N, :N].set(
        interact_mat.astype(jnp.bfloat16))

    # VMEM budget: ping-pong aggregate + double-buffered A tiles + output blocks.
    vmem_bytes = (2 * n_pad * d_pad * 2      # ping-pong bf16 aggregate scratch
                  + 2 * T * T * 2            # double-buffered bf16 A tiles
                  + 2 * T * d_pad * 4        # double-buffered f32 output blocks
                  + (8 << 20))               # headroom
    vmem_bytes = int(min(max(vmem_bytes, 16 << 20), 64 << 20))

    out = pl.pallas_call(
        _graphconv_kernel,
        out_shape=jax.ShapeDtypeStruct((n_pad, (n_hops + 1) * d_pad), jnp.float32),
        grid=(n_hops, nt, nt),
        in_specs=[
            pl.BlockSpec((T, T), lambda h, i, k: (i, k)),     # streamed A tiles
            pl.BlockSpec(memory_space=pl.ANY),                # embeddings stay in HBM
        ],
        # Lane-dense (T, D) output blocks written straight into the final
        # (N, n_hops+1, D) layout (flattened last two dims); no transpose.
        out_specs=pl.BlockSpec((T, d_pad), lambda h, i, k: (i, h + 1)),
        scratch_shapes=[
            pltpu.VMEM((2 * nt, T, d_pad), jnp.bfloat16),     # ping-pong aggregate
            pltpu.SemaphoreType.DMA,                          # init-copy semaphore
        ],
        compiler_params=pltpu.CompilerParams(
            # hop is sequential, k is a reduction, and row tiles share the
            # VMEM-resident aggregate -> no axis is megacore-parallel-safe.
            dimension_semantics=("arbitrary", "arbitrary", "arbitrary"),
            vmem_limit_bytes=vmem_bytes,
        ),
    )(adj_p, emb_bf16)

    # Hop-0 slab is just the input embeddings (exact f32); write it here with an
    # in-place dynamic-update-slice instead of burning kernel steps on a copy.
    out = out.at[:, :d_pad].set(emb_p)
    embs = out.reshape(n_pad, n_hops + 1, d_pad)[:N, :, :D]
    return embs[:n_users], embs[n_users:]


def _reference(user_embed, item_embed, interact_mat, n_hops, *, bf16):
    """Pure-JAX reference. bf16=True mirrors the kernel's rounding model."""
    all_embed = jnp.concatenate([user_embed, item_embed], axis=0)
    a = interact_mat.astype(jnp.bfloat16) if bf16 else interact_mat
    agg = all_embed
    embs = [all_embed]
    for _ in range(n_hops):
        rhs = agg.astype(jnp.bfloat16) if bf16 else agg
        agg = jnp.dot(a, rhs, preferred_element_type=jnp.float32)
        embs.append(agg)
    embs = jnp.stack(embs, axis=1)
    n_users = user_embed.shape[0]
    return embs[:n_users], embs[n_users:]


if __name__ == "__main__":
    # Small shapes that still exercise tiling AND padding (N=320 -> 512 with T=256).
    n_users, n_items, dim, n_hops = 120, 200, 128, 3
    N = n_users + n_items

    key = jax.random.PRNGKey(0)
    k_u, k_i, k_adj = jax.random.split(key, 3)

    user_embed = jax.random.normal(k_u, (n_users, dim), dtype=jnp.float32) * 0.1
    item_embed = jax.random.normal(k_i, (n_items, dim), dtype=jnp.float32) * 0.1

    # Deterministic synthetic densified sparse normalized adjacency
    # (stands in for the module's `self.interact_mat`).
    mask = (jax.random.uniform(k_adj, (N, N)) < 0.05).astype(jnp.float32)
    row_deg = jnp.maximum(mask.sum(axis=1, keepdims=True), 1.0)
    interact_mat = mask / row_deg  # row-normalized, (N, N) f32

    u_out, i_out = graph_conv_forward(user_embed, item_embed, interact_mat,
                                      n_hops, tile=256)
    jax.block_until_ready((u_out, i_out))

    assert u_out.shape == (n_users, n_hops + 1, dim)
    assert i_out.shape == (n_items, n_hops + 1, dim)

    # Primary check: bf16-matched reference (same rounding model) -> tight tol.
    u_r16, i_r16 = _reference(user_embed, item_embed, interact_mat, n_hops, bf16=True)
    assert jnp.allclose(u_out, u_r16, atol=3e-4, rtol=1e-2)
    assert jnp.allclose(i_out, i_r16, atol=3e-4, rtol=1e-2)

    # Sanity check vs. pure-f32 math (bf16 adjacency rounding -> loose tol).
    u_r32, i_r32 = _reference(user_embed, item_embed, interact_mat, n_hops, bf16=False)
    assert jnp.allclose(u_out, u_r32, atol=5e-3, rtol=5e-2)
    assert jnp.allclose(i_out, i_r32, atol=5e-3, rtol=5e-2)

    print("KERNEL_OK")
</pallas_src>

<mosaic_0001>
module attributes {stable_mosaic.version = 11 : i64} {
  func.func @_graphconv_kernel(%arg0: i32, %arg1: i32, %arg2: i32, %arg3: memref<256x256xbf16, #tpu.memory_space<vmem>>, %arg4: memref<2x256x128xbf16, #tpu.memory_space<any>>, %arg5: memref<256x128xf32, #tpu.memory_space<vmem>>, %arg6: memref<4x256x128xbf16, #tpu.memory_space<vmem>>, %arg7: memref<!tpu.dma_semaphore, #tpu.memory_space<semaphore_mem>>) attributes {dimension_semantics = [#tpu.dimension_semantics<arbitrary>, #tpu.dimension_semantics<arbitrary>, #tpu.dimension_semantics<arbitrary>], iteration_bounds = array<i64: 3, 2, 2>, scalar_prefetch = 0 : i64, scratch_operands = 2 : i64, tpu.core_type = #tpu.core_type<tc>, window_params = [{transform_indices = @transform_0, window_bounds = array<i64: 256, 256>}, {}, {transform_indices = @transform_2, window_bounds = array<i64: 256, 128>}]} {
    %c2_i32 = arith.constant 2 : i32
    %c0_i32 = arith.constant 0 : i32
    %0 = arith.cmpi eq, %c2_i32, %c0_i32 : i32
    %c1_i32 = arith.constant 1 : i32
    %1 = arith.select %0, %c1_i32, %c2_i32 : i32
    %2 = arith.remsi %arg0, %1 : i32
    %c0_i32_0 = arith.constant 0 : i32
    %3 = arith.cmpi ne, %2, %c0_i32_0 : i32
    %c0_i32_1 = arith.constant 0 : i32
    %4 = arith.cmpi slt, %2, %c0_i32_1 : i32
    %c0_i32_2 = arith.constant 0 : i32
    %5 = arith.cmpi slt, %1, %c0_i32_2 : i32
    %6 = arith.xori %4, %5 : i1
    %7 = arith.andi %6, %3 : i1
    %8 = arith.addi %2, %1 : i32
    %9 = arith.select %7, %8, %2 : i32
    %c0_i32_3 = arith.constant 0 : i32
    %10 = arith.cmpi eq, %arg0, %c0_i32_3 : i32
    %c0_i32_4 = arith.constant 0 : i32
    %11 = arith.cmpi eq, %arg1, %c0_i32_4 : i32
    %12 = arith.andi %10, %11 : i1
    %c0_i32_5 = arith.constant 0 : i32
    %13 = arith.cmpi eq, %arg2, %c0_i32_5 : i32
    %14 = arith.andi %12, %13 : i1
    %15 = arith.extui %14 : i1 to i32
    %c0_i32_6 = arith.constant 0 : i32
    %16 = arith.cmpi ne, %15, %c0_i32_6 : i32
    scf.if %16 {
      %c0_i32_19 = arith.constant 0 : i32
      %c0_i32_20 = arith.constant 0 : i32
      %c0_i32_21 = arith.constant 0 : i32
      %33 = tpu.memref_slice %arg6[%c0_i32_19, %c0_i32_20, %c0_i32_21] : memref<4x256x128xbf16, #tpu.memory_space<vmem>> -> memref<2x256x128xbf16, #tpu.memory_space<vmem>>
      tpu.enqueue_dma source(%arg4 : memref<2x256x128xbf16, #tpu.memory_space<any>>) target(%33 : memref<2x256x128xbf16, #tpu.memory_space<vmem>>) target_semaphore(%arg7 : memref<!tpu.dma_semaphore, #tpu.memory_space<semaphore_mem>>)
      %c0_i32_22 = arith.constant 0 : i32
      %c0_i32_23 = arith.constant 0 : i32
      %c0_i32_24 = arith.constant 0 : i32
      %34 = tpu.memref_slice %arg6[%c0_i32_22, %c0_i32_23, %c0_i32_24] : memref<4x256x128xbf16, #tpu.memory_space<vmem>> -> memref<2x256x128xbf16, #tpu.memory_space<vmem>>
      tpu.wait_dma2 semaphore(%arg7 : memref<!tpu.dma_semaphore, #tpu.memory_space<semaphore_mem>>) src(%arg4 : memref<2x256x128xbf16, #tpu.memory_space<any>>) dst(%34 : memref<2x256x128xbf16, #tpu.memory_space<vmem>>)
    } else {
    }
    %c0_i32_7 = arith.constant 0 : i32
    %17 = arith.cmpi eq, %arg2, %c0_i32_7 : i32
    %18 = arith.extui %17 : i1 to i32
    %c0_i32_8 = arith.constant 0 : i32
    %19 = arith.cmpi ne, %18, %c0_i32_8 : i32
    scf.if %19 {
      %cst_19 = arith.constant 0.000000e+00 : f32
      %33 = vector.broadcast %cst_19 : f32 to vector<256x128xf32>
      %c0_20 = arith.constant 0 : index
      %c0_21 = arith.constant 0 : index
      %34 = vector.load %arg5[%c0_20, %c0_21] : memref<256x128xf32, #tpu.memory_space<vmem>>, vector<256x128xf32>
      tpu.vector_store %arg5[%c0_20, %c0_21], %33 {strides = array<i32>} : memref<256x128xf32, #tpu.memory_space<vmem>>, vector<256x128xf32>,
    } else {
    }
    %c0 = arith.constant 0 : index
    %c0_9 = arith.constant 0 : index
    %20 = vector.load %arg5[%c0, %c0_9] : memref<256x128xf32, #tpu.memory_space<vmem>>, vector<256x128xf32>
    %c0_10 = arith.constant 0 : index
    %c0_11 = arith.constant 0 : index
    %21 = vector.load %arg3[%c0_10, %c0_11] : memref<256x256xbf16, #tpu.memory_space<vmem>>, vector<256x256xbf16>
    %c2_i32_12 = arith.constant 2 : i32
    %22 = arith.muli %9, %c2_i32_12 : i32
    %23 = arith.addi %22, %arg2 : i32
    %24 = arith.index_cast %23 : i32 to index
    %c0_13 = arith.constant 0 : index
    %c0_14 = arith.constant 0 : index
    %25 = vector.load %arg6[%24, %c0_13, %c0_14] : memref<4x256x128xbf16, #tpu.memory_space<vmem>>, vector<1x256x128xbf16>
    %26 = vector.shape_cast %25 : vector<1x256x128xbf16> to vector<256x128xbf16>
    %cst = arith.constant dense<0.000000e+00> : vector<256x128xf32>
    %27 = tpu.matmul %21, %26, %cst {dimension_numbers = #tpu.dot_dimension_numbers<[1], [0], [0], [1], [0, 0, 1, 1], [], []>} : vector<256x256xbf16>, vector<256x128xbf16>, vector<256x128xf32> -> vector<256x128xf32>
    %28 = arith.addf %20, %27 : vector<256x128xf32>
    %c0_15 = arith.constant 0 : index
    %c0_16 = arith.constant 0 : index
    %29 = vector.load %arg5[%c0_15, %c0_16] : memref<256x128xf32, #tpu.memory_space<vmem>>, vector<256x128xf32>
    tpu.vector_store %arg5[%c0_15, %c0_16], %28 {strides = array<i32>} : memref<256x128xf32, #tpu.memory_space<vmem>>, vector<256x128xf32>,
    %c1_i32_17 = arith.constant 1 : i32
    %30 = arith.cmpi eq, %arg2, %c1_i32_17 : i32
    %31 = arith.extui %30 : i1 to i32
    %c0_i32_18 = arith.constant 0 : i32
    %32 = arith.cmpi ne, %31, %c0_i32_18 : i32
    scf.if %32 {
      %c0_19 = arith.constant 0 : index
      %c0_20 = arith.constant 0 : index
      %33 = vector.load %arg5[%c0_19, %c0_20] : memref<256x128xf32, #tpu.memory_space<vmem>>, vector<256x128xf32>
      %34 = arith.truncf %33 : vector<256x128xf32> to vector<256x128xbf16>
      %c1_i32_21 = arith.constant 1 : i32
      %35 = arith.subi %c1_i32_21, %9 : i32
      %c2_i32_22 = arith.constant 2 : i32
      %36 = arith.muli %35, %c2_i32_22 : i32
      %37 = arith.addi %36, %arg1 : i32
      %38 = arith.index_cast %37 : i32 to index
      %c0_23 = arith.constant 0 : index
      %c0_24 = arith.constant 0 : index
      %39 = vector.load %arg6[%38, %c0_23, %c0_24] : memref<4x256x128xbf16, #tpu.memory_space<vmem>>, vector<1x256x128xbf16>
      %40 = vector.shape_cast %39 : vector<1x256x128xbf16> to vector<256x128xbf16>
      %41 = vector.shape_cast %34 : vector<256x128xbf16> to vector<1x256x128xbf16>
      tpu.vector_store %arg6[%38, %c0_23, %c0_24], %41 {strides = array<i32>} : memref<4x256x128xbf16, #tpu.memory_space<vmem>>, vector<1x256x128xbf16>,
    } else {
    }
    return
  }
  func.func @transform_0(%arg0: i32, %arg1: i32, %arg2: i32) -> (i32, i32) {
    %c0_i32 = arith.constant 0 : i32
    return %arg1, %arg2 : i32, i32
  }
  func.func @transform_2(%arg0: i32, %arg1: i32, %arg2: i32) -> (i32, i32) {
    %c1_i32 = arith.constant 1 : i32
    %0 = arith.addi %arg0, %c1_i32 : i32
    %c0_i32 = arith.constant 0 : i32
    return %arg1, %0 : i32, i32
  }
}

</mosaic_0001>

<bundles_post_ra>
// kernel: tpu_custom_call.1
= control target key start
LH: loop header
LB: loop body
LE: loop exit
PB: predicated region body
PF: predicated region fallthrough
CT: control target
= control target key end

     0   :  { %7 = vsyncpa [#allocation5], 0  ;;  %s2011_s0 = inlined_call_operand.hbm [shape: bf16[512,512], index: 0, kind: input, shape index: {}]   ;;  %s2012_s1 = inlined_call_operand.hbm [shape: bf16[2,256,128], index: 1, kind: input, shape index: {}]   ;;  %s2013_s2 = inlined_call_operand.hbm [shape: f32[512,512], index: 2, kind: output, shape index: {}]  }
   0x1   :  { %9 = vsyncpa [#allocation5 + $0x1], 0 }
   0x2   :  { %10 = vsyncpa [#allocation6], 0 }
   0x3   :  { %12 = vsyncpa [#allocation6 + $0x1], 0  ;;  %s1509_s9 = smov 0   ;;  %s1511_s10 = smov 0  }
   0x4   :  { %s1513_s11 = smov 0   ;;  %s1515_s12 = smov 0  }
   0x5   :  { %s1517_s13 = smov 0   ;;  %s1519_s14 = smov 0  }
   0x6   :  { %s1521_s15 = smov 0   ;;  %s1523_s16 = smov 0  }
   0x7   :  { %s1525_s17 = smov 0   ;;  %s1527_s18 = smov 0  }
   0x8   :  { %s1529_s19 = smov 0   ;;  %s1531_s20 = smov 0  }
   0x9   :  { %s1533_s21 = smov 0  }
   0xa LB: > { %2019 = sst [smem:[#allocation15_spill]] %s1478_s20  ;;  %s912_s22 = sadd.s32 4294967295, %s1482_s21   ;;  %s1482_s21 = sphi %s1533_s21, %s18_s21   ;;  %s1478_s20 = sphi %s1531_s20, %s2038_s20   ;;  %s1474_s19 = sphi %s1529_s19, %s2049_s19   ;;  %s1470_s18 = sphi %s1527_s18, %s2048_s18   ;;  %s1466_s17 = sphi %s1525_s17, %s2035_s17   ;;  %s1462_s16 = sphi %s1523_s16, %s2047_s16   ;;  %s1458_s15 = sphi %s1521_s15, %s2046_s15   ;;  %s1454_s14 = sphi %s1519_s14, %s2045_s14   ;;  %s1450_s13 = sphi %s1517_s13, %s2044_s13   ;;  %s1446_s12 = sphi %s1515_s12, %s2043_s12   ;;  %s1442_s11 = sphi %s1513_s11, %s2042_s11   ;;  %s1438_s10 = sphi %s1511_s10, %s2041_s10   ;;  %s1434_s9 = sphi %s1509_s9, %s2040_s9  }
   0xb   : > { %s30_s24 = sadd.s32 1, %s1470_s18  ;;  %s33_s25 = sadd.s32 1, %s1474_s19 }
   0xc   : > { %p31_p0 = scmp.ge.s32.totalorder %s30_s24, 2  ;;  %s37_s26 = sadd.s32 1, %s1478_s20 }
   0xd   : > { %s46_s27 = sadd.s32 1, %s1454_s14  ;;  %p53_p1 = scmp.ne.s32.totalorder %s1454_s14, %s1450_s13 }
   0xe   : > { %s2051_s24 = smov (%p31_p0, %s30_s24), 0  ;;  %s2053_s25 = smov (!%p31_p0, %s33_s25), %s1474_s19 }
   0xf   : > { %2020 = sst [smem:[#allocation16_spill]] %s2051_s24  ;;  %s42_s28 = ssub.s32 %s1470_s18, %s2051_s24 }
  0x10   : > { %p54_p2 = scmp.eq.s32.totalorder %s1482_s21, 0  ;;  %p35_p3 = scmp.ge.s32.totalorder %s2053_s25, 2 }
  0x11   : > { %p59_p4 = scmp.ne.s32.totalorder %s1450_s13, %s1446_s12  ;;  %p60_p6 = scmp.eq.s32.totalorder %s912_s22, 0 }
  0x12   : > { %p1590_p5 = por %p54_p2, %p53_p1  ;;  %s2055_s25 = smov (%p35_p3, %s2053_s25), 0 }
  0x13   : > { %2022 = sst [smem:[#allocation17_spill]] %s2055_s25  ;;  %s41_s3 = ssub.s32 %s1474_s19, %s2055_s25 }
  0x14   : > { %s38_s30 = scalar_select %p35_p3, %s37_s26, %s1478_s20 }
  0x15   : > { %p1601_p7 = por %p60_p6, %p59_p4  ;;  %s43_s5 = sor.u32 %s42_s28, %s41_s3 }
  0x16   : > { %p39_p8 = scmp.ge.s32.totalorder %s38_s30, 3  ;;  %p44_p9 = scmp.eq.s32.totalorder %s43_s5, 0 }
  0x17   : > { %s76_s6 = sadd.s32 1, %s1442_s11  ;;  %p86_p10 = scmp.ne.s32.totalorder %s1442_s11, %s1438_s10 }
  0x18   : > { %s2057_s30 = smov (%p39_p8, %s38_s30), 0  ;;  %p87_p11 = scmp.eq.s32.totalorder %s912_s22, 11 }
  0x19   : > { %2024 = sst [smem:[#allocation18_spill]] %s2057_s30  ;;  %s70_s8 = sadd.s32 1, %s2057_s30 }
  0x1a   : > { %s1609_s7 = scalar_select %p44_p9, %s1454_s14, %s46_s27  }
  0x1b   : > { %s72_s12 = ssub.s32 %s37_s26, %s70_s8  ;;  %p92_p12 = scmp.ne.s32.totalorder %s1438_s10, %s1434_s9 }
  0x1c   : > { %2025 = sst [smem:[#allocation19_spill]] %s1609_s7  ;;  %s73_s23 = sor.u32 %s72_s12, %s41_s3 }
  0x1d   : > { %p74_p13 = scmp.eq.s32.totalorder %s73_s23, 0  ;;  %p1618_p0 = por %p87_p11, %p86_p10 }
  0x1e   : > { %s2027_s5 = sadd.s32 4294967294, %s1482_s21   ;;  %p1119_p3 = scmp.lt.s32.totalorder %s1482_s21, 12 }
  0x1f   : > { %s2026_s28 = scalar_select %p1618_p0, 1, 0 }
  0x20   : > { %p93_p1 = scmp.eq.s32.totalorder %s2027_s5, 11  ;;  %s113_s26 = sand.u32 1, %s1454_s14  }
  0x21   : > { %s1625_s25 = scalar_select %p74_p13, %s1442_s11, %s76_s6  }
  0x22   : > { %p1627_p2 = por %p93_p1, %p92_p12  ;;  %s918_s8 = sshll.u32 %s1470_s18, 1 }
  0x23   : > { %s916_s22 = sshll.u32 %s113_s26, 8  ;;  %s973_s3 = sshll.u32 %s1474_s19, 7 }
  0x24   : > { %s2028_s27 = scalar_select %p1627_p2, 1, 0 }
  0x25   : > { %s124_s12 = sadd.s32 %s973_s3, %s918_s8  ;;  %s117_s23 = scalar_lea.vmem [#allocation4], %s916_s22 }
  0x26   : > { %s127_s30 = sshll.u32 %s117_s23, 4  ;;  %s920_s24 = sshll.u32 %s124_s12, 6  ;;  %s1635_s30 = int_to_ptr.vmem [resolvable:$true] %s127_s30 }
  0x27   : > { %s1640_s6 = scalar_lea.hbm %s2011_s0, %s920_s24  ;;  %p1644_p4 = pnand %p1119_p3, %p1590_p5 }
  0x28   : > { %s1648_s8 = scalar_lea.sflag [#allocation5], %s113_s26  ;;  %s1281_s22 = scalar_lea.hbm %s1640_s6, 4096 }
  0x29   : > { %p1282_p6 = scmp.ne.s32.totalorder %s1640_s6, %s1281_s22  ;;  %p1283_p8 = pneg %p1644_p4 }
  0x2a   : > { %s1286_s29 = scalar_lea.hbm %s2011_s0, 16384  ;;  %p1287_p5 = scmp.lt.u32.totalorder %s1640_s6, %s2011_s0 }
  0x2b   : > { %p1284_p9 = pnand %p1283_p8, %p1282_p6  ;;  %p1288_p11 = scmp.lt.u32.totalorder %s1286_s29, %s1281_s22 }
  0x2c   : > { %p1290_p13 = scmp.lt.u32.totalorder %s1281_s22, %s1640_s6 }
  0x2d   : > { %p1285_p10 = pneg %p1284_p9  ;;  %p1289_p12 = por %p1288_p11, %p1287_p5 }
  0x2f   : > { %p1291_p1 = por %p1290_p13, %p1289_p12 }
  0x31   : > { %p1292_p3 = pnand %p1291_p1, %p1285_p10 }
  0x33   : > { %1295 = shalt.err (!%p1292_p3)
}
  0x34   : > { %s1296_s26 = scalar_lea.vmem %s1635_s30, 4096  ;;  %s1484_s12 = smov [#allocation4]  }
  0x35   : > { %p1297_p6 = scmp.ne.s32.totalorder %s1635_s30, %s1296_s26  ;;  %s1301_s23 = sshll.u32 %s1484_s12, 4  ;;  %s1302_s23 = int_to_ptr.vmem [resolvable:$false] %s1301_s23 }
  0x36   : > { %s1303_s20 = scalar_lea.vmem %s1302_s23, 8192  ;;  %p1304_p0 = scmp.lt.s32.totalorder %s1635_s30, %s1302_s23 }
  0x37   : > { %p1299_p9 = pnand %p1297_p6, %p1283_p8  ;;  %p1305_p5 = scmp.lt.s32.totalorder %s1303_s20, %s1296_s26 }
  0x39   : > { %p1300_p2 = pneg %p1299_p9  ;;  %p1306_p11 = por %p1305_p5, %p1304_p0 }
  0x3b   : > { %p1307_p12 = pnand %p1306_p11, %p1300_p2 }
  0x3d   : > { %1310 = shalt.err (!%p1307_p12)
}
  0x3e   : > { %s1485_s22 = smov 256   ;;  %s1486_s24 = smov 128  }
  0x3f   : > { %s1487_s29 = smov 8   ;;  %p921_p8 = scmp.ge.s32.totalorder %s1482_s21, 1 }
  0x40   : > { %1114 = dma.hbm_to_vmem [thread:$0]  (!%p1644_p4), %s1640_s6, 4096, %s1635_s30, %s1648_s8, %s1485_s22, %s1486_s24, %s1487_s29  }
  0x41   : > { %p135_p10 = scmp.lt.s32.totalorder %s1482_s21, 13 }
  0x43   : > { %p136_p13 = pnand %p921_p8, %p135_p10 }
  0x44   : > { %s141_s7 = sand.u32 (!%p136_p13), 1, %s1450_s13  }
  0x45   : > { %139 = sbr.rel (%p136_p13) target bundleno = 481 (0x1e1), region = 24  ;;  %s922_s3 = sshll.u32 (!%p136_p13), %s141_s7, 8 }
  0x46   : > { %s142_s26 = scalar_lea.sflag (!%p136_p13), [#allocation5], %s141_s7  ;;  %s1679_s12 = scalar_lea.vmem (!%p136_p13), [#allocation4], %s922_s3 }
  0x4c   : > { %1421 = dma.done.wait (%p1601_p7), %s142_s26, 4096  }
  0x4d   : > { %1423 = vsyncadd (%p1601_p7), %s142_s26, 4294963200  ;;  %s161_s30 = sand.u32 1, %s1438_s10   ;;  %p169_p0 = scmp.lt.s32.totalorder %s1466_s17, 0 }
  0x4e   : > { %s1689_s6 = sshll.u32 %s161_s30, 8  ;;  %s170_s5 = ssub.s32 0, %s1466_s17 }
  0x4f   : > { %s924_s8 = smin.u32 %s1466_s17, %s170_s5  ;;  %p181_p2 = scmp.eq.s32.totalorder %s1466_s17, 0 }
  0x50   : > { %s172_s23 = sand.u32 1, %s924_s8   ;;  %p182_p4 = scmp.eq.s32.totalorder %s1462_s16, 0 }
  0x51   : > { %s173_s20 = ssub.s32 0, %s172_s23  ;;  %p185_p1 = scmp.eq.s32.totalorder %s1458_s15, 0 }
  0x52   : > { %s2059_s20 = smov (!%p169_p0, %s173_s20), %s172_s23  ;;  %p183_p7 = pnand %p182_p4, %p181_p2 }
  0x53   : > { %p926_p3 = scmp.lt.s32.totalorder %s2059_s20, 0  ;;  %s179_s4 = sadd.s32 2, %s2059_s20 }
  0x54   : > { %p184_p6 = pneg %p183_p7  ;;  %s1488_s24 = smov [#allocation2]  }
  0x55   : > { %s2061_s4 = smov (!%p926_p3, %s179_s4), %s2059_s20  ;;  %s197_s29 = sshll.u32 %s1488_s24, 4  ;;  %s198_s29 = int_to_ptr.vmem [resolvable:$true] %s197_s29 }
  0x56   : > { %p1698_p9 = pnand %p185_p1, %p184_p6  ;;  %s1311_s26 = scalar_lea.hbm %s2012_s1, 4096 }
  0x57   : > { %p1312_p5 = scmp.ne.s32.totalorder %s2012_s1, %s1311_s26  ;;  %p1318_p10 = scmp.lt.u32.totalorder %s1311_s26, %s2012_s1 }
  0x58   : > { %p1313_p11 = pneg %p1698_p9 }
  0x5a   : > { %p1314_p12 = pnand %p1313_p11, %p1312_p5 }
  0x5c   : > { %p1315_p8 = pneg %p1314_p12 }
  0x5e   : > { %p1320_p13 = pnand %p1318_p10, %p1315_p8 }
  0x60   : > { %1323 = shalt.err (!%p1320_p13)  }
  0x61   : > { %s1324_s24 = scalar_lea.vmem %s198_s29, 4096  ;;  %s1331_s7 = scalar_lea.vmem %s198_s29, 8192 }
  0x62   : > { %p1325_p0 = scmp.ne.s32.totalorder %s198_s29, %s1324_s24  ;;  %p1332_p7 = scmp.lt.s32.totalorder %s198_s29, %s198_s29 }
  0x63   : > { %p1333_p1 = scmp.lt.s32.totalorder %s1331_s7, %s1324_s24 }
  0x64   : > { %p1327_p2 = pnand %p1325_p0, %p1313_p11 }
  0x65   : > { %p1334_p3 = por %p1333_p1, %p1332_p7 }
  0x66   : > { %p1328_p4 = pneg %p1327_p2 }
  0x68   : > { %p1335_p6 = pnand %p1334_p3, %p1328_p4 }
  0x6a   : > { %1338 = shalt.err (!%p1335_p6)  }
  0x6b   : > { %1107 = dma.hbm_to_vmem [thread:$0]  (!%p1698_p9), %s2012_s1, 4096, %s198_s29, [#allocation3] }
  0x6c   : > { %s1719_s26 = scalar_lea.vmem [#allocation7], %s1689_s6 }
  0x6d   : > { %1425 = dma.done.wait (!%p1698_p9), [#allocation3], 4096 }
  0x6e   : > { %1427 = vsyncadd (!%p1698_p9), [#allocation3], 4294963200  ;;  %p927_p5 = scmp.ne.s32.totalorder %s1458_s15, 0 }
  0x6f   : > { %v1489_v0 = vmov (!%p927_p5), 0.0  }
  0x70   : > { %208 = sbr.rel (%p927_p5) target bundleno = 128 (0x80), region = 40  ;;  %209 = vst [vmem:[%s1719_s26] sm:$0xff] (!%p927_p5), %v1489_v0  ;;  %210 = vst [vmem:[%s1719_s26 + $0x8] sm:$0xff] (!%p927_p5), %v1489_v0 }
  0x71   : > { %211 = vst [vmem:[%s1719_s26 + $0x10] sm:$0xff] (!%p927_p5), %v1489_v0  ;;  %212 = vst [vmem:[%s1719_s26 + $0x18] sm:$0xff] (!%p927_p5), %v1489_v0 }
  0x72   : > { %213 = vst [vmem:[%s1719_s26 + $0x20] sm:$0xff] (!%p927_p5), %v1489_v0  ;;  %214 = vst [vmem:[%s1719_s26 + $0x28] sm:$0xff] (!%p927_p5), %v1489_v0 }
  0x73   : > { %215 = vst [vmem:[%s1719_s26 + $0x30] sm:$0xff] (!%p927_p5), %v1489_v0  ;;  %216 = vst [vmem:[%s1719_s26 + $0x38] sm:$0xff] (!%p927_p5), %v1489_v0 }
  0x74   : > { %217 = vst [vmem:[%s1719_s26 + $0x40] sm:$0xff] (!%p927_p5), %v1489_v0  ;;  %218 = vst [vmem:[%s1719_s26 + $0x48] sm:$0xff] (!%p927_p5), %v1489_v0 }
  0x75   : > { %219 = vst [vmem:[%s1719_s26 + $0x50] sm:$0xff] (!%p927_p5), %v1489_v0  ;;  %220 = vst [vmem:[%s1719_s26 + $0x58] sm:$0xff] (!%p927_p5), %v1489_v0 }
  0x76   : > { %221 = vst [vmem:[%s1719_s26 + $0x60] sm:$0xff] (!%p927_p5), %v1489_v0  ;;  %222 = vst [vmem:[%s1719_s26 + $0x68] sm:$0xff] (!%p927_p5), %v1489_v0 }
  0x77   : > { %223 = vst [vmem:[%s1719_s26 + $0x70] sm:$0xff] %v1489_v0  ;;  %224 = vst [vmem:[%s1719_s26 + $0x78] sm:$0xff] %v1489_v0 }
  0x78   : > { %225 = vst [vmem:[%s1719_s26 + $0x80] sm:$0xff] %v1489_v0  ;;  %226 = vst [vmem:[%s1719_s26 + $0x88] sm:$0xff] %v1489_v0 }
  0x79   : > { %227 = vst [vmem:[%s1719_s26 + $0x90] sm:$0xff] %v1489_v0  ;;  %228 = vst [vmem:[%s1719_s26 + $0x98] sm:$0xff] %v1489_v0 }
  0x7a   : > { %229 = vst [vmem:[%s1719_s26 + $0xa0] sm:$0xff] %v1489_v0  ;;  %230 = vst [vmem:[%s1719_s26 + $0xa8] sm:$0xff] %v1489_v0 }
  0x7b   : > { %231 = vst [vmem:[%s1719_s26 + $0xb0] sm:$0xff] %v1489_v0  ;;  %232 = vst [vmem:[%s1719_s26 + $0xb8] sm:$0xff] %v1489_v0 }
  0x7c   : > { %233 = vst [vmem:[%s1719_s26 + $0xc0] sm:$0xff] %v1489_v0  ;;  %234 = vst [vmem:[%s1719_s26 + $0xc8] sm:$0xff] %v1489_v0 }
  0x7d   : > { %235 = vst [vmem:[%s1719_s26 + $0xd0] sm:$0xff] %v1489_v0  ;;  %236 = vst [vmem:[%s1719_s26 + $0xd8] sm:$0xff] %v1489_v0 }
  0x7e   : > { %237 = vst [vmem:[%s1719_s26 + $0xe0] sm:$0xff] %v1489_v0  ;;  %238 = vst [vmem:[%s1719_s26 + $0xe8] sm:$0xff] %v1489_v0 }
  0x7f   : > { %239 = vst [vmem:[%s1719_s26 + $0xf0] sm:$0xff] %v1489_v0  ;;  %240 = vst [vmem:[%s1719_s26 + $0xf8] sm:$0xff] %v1489_v0 }
  0x80 PF: > { %s928_s6 = sshll.u32 %s2061_s4, 1  ;;  %v1235_v1 = vld [vmem:[%s1679_s12 + $0x4] ss:$8 sps:$4 sm:$0xff]   ;;  %v1233_v19 = vld [vmem:[%s1679_s12] ss:$8 sps:$4 sm:$0xff]   ;;  %p963_p9 = scmp.ne.s32.totalorder %s1458_s15, 1 }
  0x81   : > { %s306_s22 = sadd.s32 %s1458_s15, %s928_s6  ;;  %v1238_v2 = vld [vmem:[%s1679_s12 + $0x84] ss:$8 sps:$4 sm:$0xff]   ;;  %518 = vmatprep.mubr.bf16.mxu0 %v1235_v1  ;;  %v1236_v20 = vld [vmem:[%s1679_s12 + $0x80] ss:$8 sps:$4 sm:$0xff]   ;;  %v1239_v21 = vld [vmem:[%s1679_s12 + $0x14] ss:$8 sps:$4 sm:$0xff]  }
  0x82   : > { %s974_s29 = sshll.u32 %s306_s22, 7  ;;  %582 = vmatprep.mubr.bf16.mxu1 %v1238_v2  ;;  %v1241_v22 = vld [vmem:[%s1679_s12 + $0x94] ss:$8 sps:$4 sm:$0xff]   ;;  %v1243_v23 = vld [vmem:[%s1679_s12 + $0x10] ss:$8 sps:$4 sm:$0xff]   ;;  %v241_v51 = vld [vmem:[%s1719_s26] sm:$0xff] }
  0x83   : > { %s1762_s8 = scalar_lea.vmem [#allocation2], %s974_s29  ;;  %v1244_v24 = vld [vmem:[%s1679_s12 + $0x90] ss:$8 sps:$4 sm:$0xff]   ;;  %v1245_v25 = vld [vmem:[%s1679_s12 + $0x24] ss:$8 sps:$4 sm:$0xff]  }
  0x84   : > { %v318_v3 = vld [vmem:[%s1762_s8 + $0x40] sm:$0xff]  ;;  %v319_v5 = vld [vmem:[%s1762_s8 + $0x48] sm:$0xff]  ;;  %v320_v7 = vld [vmem:[%s1762_s8 + $0x50] sm:$0xff] }
  0x85   : > { %v310_v4 = vld [vmem:[%s1762_s8] sm:$0xff]  ;;  %976 = vmatprep.subr.bf16.mxu0 %v318_v3  ;;  %1088 = vmatprep.subr.bf16.mxu1 %v318_v3  ;;  %v311_v6 = vld [vmem:[%s1762_s8 + $0x8] sm:$0xff]  ;;  %v312_v8 = vld [vmem:[%s1762_s8 + $0x10] sm:$0xff] }
  0x86   : > { %977 = vmatpush3.bf16.msra.mxu0 %v310_v4  ;;  %1096 = vmatpush3.bf16.msra.mxu1 %v310_v4  ;;  %v321_v9 = vld [vmem:[%s1762_s8 + $0x58] sm:$0xff]  ;;  %v322_v11 = vld [vmem:[%s1762_s8 + $0x60] sm:$0xff]  ;;  %v323_v13 = vld [vmem:[%s1762_s8 + $0x68] sm:$0xff] }
  0x87   : > { %978 = vmatprep.subr.bf16.mxu0 %v319_v5  ;;  %1089 = vmatprep.subr.bf16.mxu1 %v319_v5  ;;  %v313_v10 = vld [vmem:[%s1762_s8 + $0x18] sm:$0xff]  ;;  %v314_v12 = vld [vmem:[%s1762_s8 + $0x20] sm:$0xff]  ;;  %v315_v14 = vld [vmem:[%s1762_s8 + $0x28] sm:$0xff] }
  0x88   : > { %v324_v15 = vld [vmem:[%s1762_s8 + $0x70] sm:$0xff]  ;;  %v325_v17 = vld [vmem:[%s1762_s8 + $0x78] sm:$0xff]  ;;  %v1247_v26 = vld [vmem:[%s1679_s12 + $0xa4] ss:$8 sps:$4 sm:$0xff]  }
  0x89   : > { %v316_v16 = vld [vmem:[%s1762_s8 + $0x30] sm:$0xff]  ;;  %v317_v18 = vld [vmem:[%s1762_s8 + $0x38] sm:$0xff]  ;;  %v1249_v27 = vld [vmem:[%s1679_s12 + $0x20] ss:$8 sps:$4 sm:$0xff]  }
  0x8a   : > { %979 = vmatpush3.bf16.msra.mxu0 %v311_v6  ;;  %1097 = vmatpush3.bf16.msra.mxu1 %v311_v6  ;;  %v1250_v28 = vld [vmem:[%s1679_s12 + $0xa0] ss:$8 sps:$4 sm:$0xff]   ;;  %v1251_v29 = vld [vmem:[%s1679_s12 + $0x34] ss:$8 sps:$4 sm:$0xff]   ;;  %v1255_v31 = vld [vmem:[%s1679_s12 + $0x30] ss:$8 sps:$4 sm:$0xff]  }
  0x8b   : > { %980 = vmatprep.subr.bf16.mxu0 %v320_v7  ;;  %1090 = vmatprep.subr.bf16.mxu1 %v320_v7  ;;  %v1253_v30 = vld [vmem:[%s1679_s12 + $0xb4] ss:$8 sps:$4 sm:$0xff]   ;;  %v1256_v32 = vld [vmem:[%s1679_s12 + $0xb0] ss:$8 sps:$4 sm:$0xff]   ;;  %v1257_v33 = vld [vmem:[%s1679_s12 + $0x44] ss:$8 sps:$4 sm:$0xff]  }
  0x8c   : > { %v1259_v34 = vld [vmem:[%s1679_s12 + $0xc4] ss:$8 sps:$4 sm:$0xff]   ;;  %v1261_v35 = vld [vmem:[%s1679_s12 + $0x40] ss:$8 sps:$4 sm:$0xff]   ;;  %v1263_v37 = vld [vmem:[%s1679_s12 + $0x54] ss:$8 sps:$4 sm:$0xff]  }
  0x8d   : > { %v1262_v36 = vld [vmem:[%s1679_s12 + $0xc0] ss:$8 sps:$4 sm:$0xff]   ;;  %v1265_v38 = vld [vmem:[%s1679_s12 + $0xd4] ss:$8 sps:$4 sm:$0xff]   ;;  %v1267_v39 = vld [vmem:[%s1679_s12 + $0x50] ss:$8 sps:$4 sm:$0xff]  }
  0x8e   : > { %981 = vmatpush3.bf16.msra.mxu0 %v312_v8  ;;  %1098 = vmatpush3.bf16.msra.mxu1 %v312_v8  ;;  %v1268_v40 = vld [vmem:[%s1679_s12 + $0xd0] ss:$8 sps:$4 sm:$0xff]   ;;  %v1269_v41 = vld [vmem:[%s1679_s12 + $0x64] ss:$8 sps:$4 sm:$0xff]   ;;  %v1273_v43 = vld [vmem:[%s1679_s12 + $0x60] ss:$8 sps:$4 sm:$0xff]  }
  0x8f   : > { %982 = vmatprep.subr.bf16.mxu0 %v321_v9  ;;  %1091 = vmatprep.subr.bf16.mxu1 %v321_v9  ;;  %v1271_v42 = vld [vmem:[%s1679_s12 + $0xe4] ss:$8 sps:$4 sm:$0xff]   ;;  %v1274_v44 = vld [vmem:[%s1679_s12 + $0xe0] ss:$8 sps:$4 sm:$0xff]   ;;  %v1275_v45 = vld [vmem:[%s1679_s12 + $0x74] ss:$8 sps:$4 sm:$0xff]  }
  0x90   : > { %v1277_v46 = vld [vmem:[%s1679_s12 + $0xf4] ss:$8 sps:$4 sm:$0xff]   ;;  %v1279_v47 = vld [vmem:[%s1679_s12 + $0x70] ss:$8 sps:$4 sm:$0xff]   ;;  %v257_v53 = vld [vmem:[%s1719_s26 + $0x80] sm:$0xff] }
  0x91   : > { %v1280_v48 = vld [vmem:[%s1679_s12 + $0xf0] ss:$8 sps:$4 sm:$0xff]   ;;  %v242_v59 = vld [vmem:[%s1719_s26 + $0x8] sm:$0xff]  ;;  %s763_s12 = ssub.s32 (!%p963_p9), 1, %s2061_s4 }
  0x92   : > { %983 = vmatpush3.bf16.msra.mxu0 %v313_v10  ;;  %1099 = vmatpush3.bf16.msra.mxu1 %v313_v10  ;;  %v258_v61 = vld [vmem:[%s1719_s26 + $0x88] sm:$0xff]  ;;  %v243_v7 = vld [vmem:[%s1719_s26 + $0x10] sm:$0xff]  ;;  %s964_s15 = sshll.u32 (!%p963_p9), %s763_s12, 1 }
  0x93   : > { %984 = vmatprep.subr.bf16.mxu0 %v322_v11  ;;  %1092 = vmatprep.subr.bf16.mxu1 %v322_v11  ;;  %v259_v9 = vld [vmem:[%s1719_s26 + $0x90] sm:$0xff]  ;;  %s765_s23 = sadd.s32 (!%p963_p9), %s1462_s16, %s964_s15 }
  0x94   : > { %s975_s20 = sshll.u32 (!%p963_p9), %s765_s23, 7 }
  0x95   : > { %s1892_s4 = scalar_lea.vmem (!%p963_p9), [#allocation2], %s975_s20 }
  0x96   : > { %985 = vmatpush3.bf16.msra.mxu0 %v314_v12  ;;  %1100 = vmatpush3.bf16.msra.mxu1 %v314_v12 }
  0x97   : > { %986 = vmatprep.subr.bf16.mxu0 %v323_v13  ;;  %1093 = vmatprep.subr.bf16.mxu1 %v323_v13 }
  0x9a   : > { %987 = vmatpush3.bf16.msra.mxu0 %v315_v14  ;;  %1101 = vmatpush3.bf16.msra.mxu1 %v315_v14 }
  0x9b   : > { %988 = vmatprep.subr.bf16.mxu0 %v324_v15  ;;  %1094 = vmatprep.subr.bf16.mxu1 %v324_v15  ;;  %v244_v15 = vld [vmem:[%s1719_s26 + $0x18] sm:$0xff] }
  0x9e   : > { %989 = vmatpush3.bf16.msra.mxu0 %v316_v16  ;;  %1102 = vmatpush3.bf16.msra.mxu1 %v316_v16 }
  0x9f   : > { %990 = vmatprep.subr.bf16.mxu0 %v325_v17  ;;  %1095 = vmatprep.subr.bf16.mxu1 %v325_v17  ;;  %v260_v17 = vld [vmem:[%s1719_s26 + $0x98] sm:$0xff] }
  0xa2   : > { %991 = vmatpush3.bf16.msra.mxu0 %v317_v18  ;;  %1103 = vmatpush3.bf16.msra.mxu1 %v317_v18 }
  0xa5   : > { %519 = vmatmul.mubr.bf16.vlgmr.msra.gmra.mrb[0].mxu0 %v1233_v19  ;;  %583 = vmatmul.mubr.bf16.vlgmr.msra.gmra.mrb[0].mxu1 %v1236_v20 }
  0xa6   : > { %526 = vmatprep.mubr.bf16.mxu0 %v1239_v21  ;;  %590 = vmatprep.mubr.bf16.mxu1 %v1241_v22 }
  0xad   : > { %527 = vmatmul.mubr.bf16.gmra.mrb[4].mxu0 %v1243_v23  ;;  %591 = vmatmul.mubr.bf16.gmra.mrb[4].mxu1 %v1244_v24 }
  0xae   : > { %534 = vmatprep.mubr.bf16.mxu0 %v1245_v25  ;;  %598 = vmatprep.mubr.bf16.mxu1 %v1247_v26 }
  0xb5   : > { %535 = vmatmul.mubr.bf16.gmra.mrb[8].mxu0 %v1249_v27  ;;  %599 = vmatmul.mubr.bf16.gmra.mrb[8].mxu1 %v1250_v28  ;;  %v245_v27 = vld [vmem:[%s1719_s26 + $0x20] sm:$0xff] }
  0xb6   : > { %542 = vmatprep.mubr.bf16.mxu0 %v1251_v29  ;;  %606 = vmatprep.mubr.bf16.mxu1 %v1253_v30  ;;  %v261_v29 = vld [vmem:[%s1719_s26 + $0xa0] sm:$0xff] }
  0xbd   : > { %543 = vmatmul.mubr.bf16.gmra.mrb[12].mxu0 %v1255_v31  ;;  %607 = vmatmul.mubr.bf16.gmra.mrb[12].mxu1 %v1256_v32 }
  0xbe   : > { %550 = vmatprep.mubr.bf16.mxu0 %v1257_v33  ;;  %614 = vmatprep.mubr.bf16.mxu1 %v1259_v34 }
  0xc5   : > { %551 = vmatmul.mubr.bf16.gmra.mrb[16].mxu0 %v1261_v35  ;;  %615 = vmatmul.mubr.bf16.gmra.mrb[16].mxu1 %v1262_v36  ;;  %v246_v35 = vld [vmem:[%s1719_s26 + $0x28] sm:$0xff] }
  0xc6   : > { %558 = vmatprep.mubr.bf16.mxu0 %v1263_v37  ;;  %622 = vmatprep.mubr.bf16.mxu1 %v1265_v38  ;;  %v262_v37 = vld [vmem:[%s1719_s26 + $0xa8] sm:$0xff] }
  0xcd   : > { %559 = vmatmul.mubr.bf16.gmra.mrb[20].mxu0 %v1267_v39  ;;  %623 = vmatmul.mubr.bf16.gmra.mrb[20].mxu1 %v1268_v40 }
  0xce   : > { %566 = vmatprep.mubr.bf16.mxu0 %v1269_v41  ;;  %630 = vmatprep.mubr.bf16.mxu1 %v1271_v42 }
  0xd5   : > { %567 = vmatmul.mubr.bf16.gmra.mrb[24].mxu0 %v1273_v43  ;;  %631 = vmatmul.mubr.bf16.gmra.mrb[24].mxu1 %v1274_v44 }
  0xd6   : > { %574 = vmatprep.mubr.bf16.mxu0 %v1275_v45  ;;  %638 = vmatprep.mubr.bf16.mxu1 %v1277_v46 }
  0xdd   : > { %575 = vmatmul.mubr.bf16.gmra.mrb[28].mxu0 %v1279_v47  ;;  %639 = vmatmul.mubr.bf16.gmra.mrb[28].mxu1 %v1280_v48  ;;  %v247_v47 = vld [vmem:[%s1719_s26 + $0x30] sm:$0xff] }
 0x178   : > { %v992_v49 = vpop.f32.mrb[0].mxu0  ;;  %v1040_v50 = vpop.f32.mrb[0].mxu1 }
 0x179   : > { %v993_v52 = vpop.f32.mrb[1].mxu0  ;;  %v1041_v54 = vpop.f32.mrb[1].mxu1 }
 0x17a   : > { %v994_v55 = vadd.f32 %v993_v52, %v992_v49  ;;  %v1042_v56 = vadd.f32 %v1041_v54, %v1040_v50  ;;  %v995_v57 = vpop.f32.mrb[2].mxu0  ;;  %v1043_v58 = vpop.f32.mrb[2].mxu1  ;;  %v263_v49 = vld [vmem:[%s1719_s26 + $0xb0] sm:$0xff] }
 0x17b   : > { %v996_v60 = vpop.f32.mrb[3].mxu0  ;;  %v1044_v62 = vpop.f32.mrb[3].mxu1 }
 0x17c   : > { %v647_v63 = vadd.f32 %v994_v55, %v241_v51  ;;  %v663_v0 = vadd.f32 %v1042_v56, %v257_v53  ;;  %v997_v1 = vadd.f32 %v996_v60, %v995_v57  ;;  %v1045_v2 = vadd.f32 %v1044_v62, %v1043_v58  ;;  %v248_v55 = vld [vmem:[%s1719_s26 + $0x38] sm:$0xff] }
 0x17d   : > { %v264_v57 = vld [vmem:[%s1719_s26 + $0xb8] sm:$0xff] }
 0x17e   : > { %679 = vst [vmem:[%s1719_s26] sm:$0xff] %v647_v63  ;;  %695 = vst [vmem:[%s1719_s26 + $0x80] sm:$0xff] %v663_v0  ;;  %v648_v3 = vadd.f32 %v997_v1, %v242_v59  ;;  %v664_v4 = vadd.f32 %v1045_v2, %v258_v61 }
 0x180   : > { %680 = vst [vmem:[%s1719_s26 + $0x8] sm:$0xff] %v648_v3  ;;  %696 = vst [vmem:[%s1719_s26 + $0x88] sm:$0xff] %v664_v4  ;;  %v998_v5 = vpop.f32.mrb[4].mxu0  ;;  %v1046_v6 = vpop.f32.mrb[4].mxu1  ;;  %v249_v3 = vld [vmem:[%s1719_s26 + $0x40] sm:$0xff] }
 0x181   : > { %v999_v8 = vpop.f32.mrb[5].mxu0  ;;  %v1047_v10 = vpop.f32.mrb[5].mxu1 }
 0x182   : > { %v1000_v11 = vadd.f32 %v999_v8, %v998_v5  ;;  %v1048_v12 = vadd.f32 %v1047_v10, %v1046_v6  ;;  %v1001_v13 = vpop.f32.mrb[6].mxu0  ;;  %v1049_v14 = vpop.f32.mrb[6].mxu1  ;;  %v265_v5 = vld [vmem:[%s1719_s26 + $0xc0] sm:$0xff] }
 0x183   : > { %v1002_v16 = vpop.f32.mrb[7].mxu0  ;;  %v1050_v18 = vpop.f32.mrb[7].mxu1 }
 0x184   : > { %v649_v19 = vadd.f32 %v1000_v11, %v243_v7  ;;  %v665_v20 = vadd.f32 %v1048_v12, %v259_v9  ;;  %v1003_v21 = vadd.f32 %v1002_v16, %v1001_v13  ;;  %v1051_v22 = vadd.f32 %v1050_v18, %v1049_v14  ;;  %v250_v11 = vld [vmem:[%s1719_s26 + $0x48] sm:$0xff] }
 0x185   : > { %v266_v13 = vld [vmem:[%s1719_s26 + $0xc8] sm:$0xff] }
 0x186   : > { %681 = vst [vmem:[%s1719_s26 + $0x10] sm:$0xff] %v649_v19  ;;  %697 = vst [vmem:[%s1719_s26 + $0x90] sm:$0xff] %v665_v20  ;;  %v650_v23 = vadd.f32 %v1003_v21, %v244_v15  ;;  %v666_v24 = vadd.f32 %v1051_v22, %v260_v17 }
 0x188   : > { %682 = vst [vmem:[%s1719_s26 + $0x18] sm:$0xff] %v650_v23  ;;  %698 = vst [vmem:[%s1719_s26 + $0x98] sm:$0xff] %v666_v24  ;;  %v1004_v25 = vpop.f32.mrb[8].mxu0  ;;  %v1052_v26 = vpop.f32.mrb[8].mxu1  ;;  %v251_v23 = vld [vmem:[%s1719_s26 + $0x50] sm:$0xff] }
 0x189   : > { %v1005_v28 = vpop.f32.mrb[9].mxu0  ;;  %v1053_v30 = vpop.f32.mrb[9].mxu1 }
 0x18a   : > { %v1006_v31 = vadd.f32 %v1005_v28, %v1004_v25  ;;  %v1054_v32 = vadd.f32 %v1053_v30, %v1052_v26  ;;  %v1007_v33 = vpop.f32.mrb[10].mxu0  ;;  %v1055_v34 = vpop.f32.mrb[10].mxu1  ;;  %v267_v25 = vld [vmem:[%s1719_s26 + $0xd0] sm:$0xff] }
 0x18b   : > { %v1008_v36 = vpop.f32.mrb[11].mxu0  ;;  %v1056_v38 = vpop.f32.mrb[11].mxu1 }
 0x18c   : > { %v651_v39 = vadd.f32 %v1006_v31, %v245_v27  ;;  %v667_v40 = vadd.f32 %v1054_v32, %v261_v29  ;;  %v1009_v41 = vadd.f32 %v1008_v36, %v1007_v33  ;;  %v1057_v42 = vadd.f32 %v1056_v38, %v1055_v34  ;;  %v252_v31 = vld [vmem:[%s1719_s26 + $0x58] sm:$0xff] }
 0x18d   : > { %v268_v33 = vld [vmem:[%s1719_s26 + $0xd8] sm:$0xff] }
 0x18e   : > { %683 = vst [vmem:[%s1719_s26 + $0x20] sm:$0xff] %v651_v39  ;;  %699 = vst [vmem:[%s1719_s26 + $0xa0] sm:$0xff] %v667_v40  ;;  %v652_v43 = vadd.f32 %v1009_v41, %v246_v35  ;;  %v668_v44 = vadd.f32 %v1057_v42, %v262_v37 }
 0x190   : > { %684 = vst [vmem:[%s1719_s26 + $0x28] sm:$0xff] %v652_v43  ;;  %700 = vst [vmem:[%s1719_s26 + $0xa8] sm:$0xff] %v668_v44  ;;  %v1010_v45 = vpop.f32.mrb[12].mxu0  ;;  %v1058_v46 = vpop.f32.mrb[12].mxu1  ;;  %v253_v43 = vld [vmem:[%s1719_s26 + $0x60] sm:$0xff] }
 0x191   : > { %v1011_v48 = vpop.f32.mrb[13].mxu0  ;;  %v1059_v50 = vpop.f32.mrb[13].mxu1 }
 0x192   : > { %v1012_v51 = vadd.f32 %v1011_v48, %v1010_v45  ;;  %v1060_v52 = vadd.f32 %v1059_v50, %v1058_v46  ;;  %v1013_v53 = vpop.f32.mrb[14].mxu0  ;;  %v1061_v54 = vpop.f32.mrb[14].mxu1  ;;  %v269_v45 = vld [vmem:[%s1719_s26 + $0xe0] sm:$0xff] }
 0x193   : > { %v1014_v56 = vpop.f32.mrb[15].mxu0  ;;  %v1062_v58 = vpop.f32.mrb[15].mxu1 }
 0x194   : > { %v653_v59 = vadd.f32 %v1012_v51, %v247_v47  ;;  %v669_v60 = vadd.f32 %v1060_v52, %v263_v49  ;;  %v1015_v61 = vadd.f32 %v1014_v56, %v1013_v53  ;;  %v1063_v62 = vadd.f32 %v1062_v58, %v1061_v54  ;;  %v254_v51 = vld [vmem:[%s1719_s26 + $0x68] sm:$0xff] }
 0x195   : > { %v270_v53 = vld [vmem:[%s1719_s26 + $0xe8] sm:$0xff] }
 0x196   : > { %685 = vst [vmem:[%s1719_s26 + $0x30] sm:$0xff] %v653_v59  ;;  %701 = vst [vmem:[%s1719_s26 + $0xb0] sm:$0xff] %v669_v60  ;;  %v654_v63 = vadd.f32 %v1015_v61, %v248_v55  ;;  %v670_v0 = vadd.f32 %v1063_v62, %v264_v57 }
 0x198   : > { %686 = vst [vmem:[%s1719_s26 + $0x38] sm:$0xff] %v654_v63  ;;  %702 = vst [vmem:[%s1719_s26 + $0xb8] sm:$0xff] %v670_v0  ;;  %v1016_v1 = vpop.f32.mrb[16].mxu0  ;;  %v1064_v2 = vpop.f32.mrb[16].mxu1  ;;  %v255_v63 = vld [vmem:[%s1719_s26 + $0x70] sm:$0xff] }
 0x199   : > { %v1017_v4 = vpop.f32.mrb[17].mxu0  ;;  %v1065_v6 = vpop.f32.mrb[17].mxu1 }
 0x19a   : > { %v1018_v7 = vadd.f32 %v1017_v4, %v1016_v1  ;;  %v1066_v8 = vadd.f32 %v1065_v6, %v1064_v2  ;;  %v1019_v9 = vpop.f32.mrb[18].mxu0  ;;  %v1067_v10 = vpop.f32.mrb[18].mxu1  ;;  %v271_v1 = vld [vmem:[%s1719_s26 + $0xf0] sm:$0xff] }
 0x19b   : > { %v1020_v12 = vpop.f32.mrb[19].mxu0  ;;  %v1068_v14 = vpop.f32.mrb[19].mxu1 }
 0x19c   : > { %v655_v15 = vadd.f32 %v1018_v7, %v249_v3  ;;  %v671_v16 = vadd.f32 %v1066_v8, %v265_v5  ;;  %v1021_v17 = vadd.f32 %v1020_v12, %v1019_v9  ;;  %v1069_v18 = vadd.f32 %v1068_v14, %v1067_v10  ;;  %v256_v7 = vld [vmem:[%s1719_s26 + $0x78] sm:$0xff] }
 0x19d   : > { %v272_v9 = vld [vmem:[%s1719_s26 + $0xf8] sm:$0xff] }
 0x19e   : > { %687 = vst [vmem:[%s1719_s26 + $0x40] sm:$0xff] %v655_v15  ;;  %703 = vst [vmem:[%s1719_s26 + $0xc0] sm:$0xff] %v671_v16  ;;  %v656_v19 = vadd.f32 %v1021_v17, %v250_v11  ;;  %v672_v20 = vadd.f32 %v1069_v18, %v266_v13  ;;  %v715_v17 = vld [vmem:[%s1719_s26] sm:$0xff] (!%p963_p9)  ;;  %v716_v18 = vld [vmem:[%s1719_s26 + $0x8] sm:$0xff] (!%p963_p9) }
 0x1a0   : > { %688 = vst [vmem:[%s1719_s26 + $0x48] sm:$0xff] %v656_v19  ;;  %704 = vst [vmem:[%s1719_s26 + $0xc8] sm:$0xff] %v672_v20  ;;  %v1022_v21 = vpop.f32.mrb[20].mxu0  ;;  %v1070_v22 = vpop.f32.mrb[20].mxu1  ;;  %v717_v19 = vld [vmem:[%s1719_s26 + $0x10] sm:$0xff] (!%p963_p9)  ;;  %v747_v20 = vpack.c.bf16 (!%p963_p9), %v716_v18, %v715_v17 }
 0x1a1   : > { %v1023_v24 = vpop.f32.mrb[21].mxu0  ;;  %v1071_v26 = vpop.f32.mrb[21].mxu1 }
 0x1a2   : > { %v1024_v27 = vadd.f32 %v1023_v24, %v1022_v21  ;;  %v1072_v28 = vadd.f32 %v1071_v26, %v1070_v22  ;;  %v1025_v29 = vpop.f32.mrb[22].mxu0  ;;  %v1073_v30 = vpop.f32.mrb[22].mxu1  ;;  %v718_v21 = vld [vmem:[%s1719_s26 + $0x18] sm:$0xff] (!%p963_p9)  ;;  %v719_v22 = vld [vmem:[%s1719_s26 + $0x20] sm:$0xff] (!%p963_p9)  ;;  %v721_v26 = vld [vmem:[%s1719_s26 + $0x30] sm:$0xff] (!%p963_p9)  ;;  %769 = vst [vmem:[%s1892_s4] sm:$0xff] (!%p963_p9), %v747_v20 }
 0x1a3   : > { %v1026_v32 = vpop.f32.mrb[23].mxu0  ;;  %v1074_v34 = vpop.f32.mrb[23].mxu1  ;;  %v748_v24 = vpack.c.bf16 (!%p963_p9), %v718_v21, %v717_v19 }
 0x1a4   : > { %v657_v35 = vadd.f32 %v1024_v27, %v251_v23  ;;  %v673_v36 = vadd.f32 %v1072_v28, %v267_v25  ;;  %v1027_v37 = vadd.f32 %v1026_v32, %v1025_v29  ;;  %v1075_v38 = vadd.f32 %v1074_v34, %v1073_v30  ;;  %v720_v23 = vld [vmem:[%s1719_s26 + $0x28] sm:$0xff] (!%p963_p9)  ;;  %v722_v27 = vld [vmem:[%s1719_s26 + $0x38] sm:$0xff] (!%p963_p9) }
 0x1a5   : > { %v749_v25 = vpack.c.bf16 (!%p963_p9), %v720_v23, %v719_v22  ;;  %v723_v28 = vld [vmem:[%s1719_s26 + $0x40] sm:$0xff] (!%p963_p9)  ;;  %v750_v29 = vpack.c.bf16 (!%p963_p9), %v722_v27, %v721_v26  ;;  %770 = vst [vmem:[%s1892_s4 + $0x8] sm:$0xff] (!%p963_p9), %v748_v24 }
 0x1a6   : > { %689 = vst [vmem:[%s1719_s26 + $0x50] sm:$0xff] %v657_v35  ;;  %705 = vst [vmem:[%s1719_s26 + $0xd0] sm:$0xff] %v673_v36  ;;  %v658_v39 = vadd.f32 %v1027_v37, %v252_v31  ;;  %v674_v40 = vadd.f32 %v1075_v38, %v268_v33 }
 0x1a7   : > { %v724_v30 = vld [vmem:[%s1719_s26 + $0x48] sm:$0xff] (!%p963_p9)  ;;  %771 = vst [vmem:[%s1892_s4 + $0x10] sm:$0xff] (!%p963_p9), %v749_v25  ;;  %772 = vst [vmem:[%s1892_s4 + $0x18] sm:$0xff] (!%p963_p9), %v750_v29 }
 0x1a8   : > { %690 = vst [vmem:[%s1719_s26 + $0x58] sm:$0xff] %v658_v39  ;;  %706 = vst [vmem:[%s1719_s26 + $0xd8] sm:$0xff] %v674_v40  ;;  %v1028_v41 = vpop.f32.mrb[24].mxu0  ;;  %v1076_v42 = vpop.f32.mrb[24].mxu1  ;;  %v751_v33 = vpack.c.bf16 (!%p963_p9), %v724_v30, %v723_v28  ;;  %v731_v40 = vld [vmem:[%s1719_s26 + $0x80] sm:$0xff] (!%p963_p9) }
 0x1a9   : > { %v1029_v44 = vpop.f32.mrb[25].mxu0  ;;  %v1077_v46 = vpop.f32.mrb[25].mxu1 }
 0x1aa   : > { %v1030_v47 = vadd.f32 %v1029_v44, %v1028_v41  ;;  %v1078_v48 = vadd.f32 %v1077_v46, %v1076_v42  ;;  %v1031_v49 = vpop.f32.mrb[26].mxu0  ;;  %v1079_v50 = vpop.f32.mrb[26].mxu1  ;;  %v732_v41 = vld [vmem:[%s1719_s26 + $0x88] sm:$0xff] (!%p963_p9)  ;;  %773 = vst [vmem:[%s1892_s4 + $0x20] sm:$0xff] (!%p963_p9), %v751_v33  ;;  %v733_v44 = vld [vmem:[%s1719_s26 + $0x90] sm:$0xff] (!%p963_p9)  ;;  %v735_v46 = vld [vmem:[%s1719_s26 + $0xa0] sm:$0xff] (!%p963_p9) }
 0x1ab   : > { %v1032_v52 = vpop.f32.mrb[27].mxu0  ;;  %v1080_v54 = vpop.f32.mrb[27].mxu1 }
 0x1ac   : > { %v659_v55 = vadd.f32 %v1030_v47, %v253_v43  ;;  %v675_v56 = vadd.f32 %v1078_v48, %v269_v45  ;;  %v1033_v57 = vadd.f32 %v1032_v52, %v1031_v49  ;;  %v1081_v58 = vadd.f32 %v1080_v54, %v1079_v50  ;;  %v734_v45 = vld [vmem:[%s1719_s26 + $0x98] sm:$0xff] (!%p963_p9)  ;;  %v736_v48 = vld [vmem:[%s1719_s26 + $0xa8] sm:$0xff] (!%p963_p9)  ;;  %v737_v49 = vld [vmem:[%s1719_s26 + $0xb0] sm:$0xff] (!%p963_p9) }
 0x1ad   : > { %v725_v31 = vld [vmem:[%s1719_s26 + $0x50] sm:$0xff] (!%p963_p9)  ;;  %v755_v43 = vpack.c.bf16 (!%p963_p9), %v732_v41, %v731_v40  ;;  %v756_v47 = vpack.c.bf16 (!%p963_p9), %v734_v45, %v733_v44  ;;  %v738_v50 = vld [vmem:[%s1719_s26 + $0xb8] sm:$0xff] (!%p963_p9)  ;;  %v740_v54 = vld [vmem:[%s1719_s26 + $0xc8] sm:$0xff] (!%p963_p9) }
 0x1ae   : > { %691 = vst [vmem:[%s1719_s26 + $0x60] sm:$0xff] %v659_v55  ;;  %707 = vst [vmem:[%s1719_s26 + $0xe0] sm:$0xff] %v675_v56  ;;  %v660_v59 = vadd.f32 %v1033_v57, %v254_v51  ;;  %v676_v60 = vadd.f32 %v1081_v58, %v270_v53  ;;  %v757_v51 = vpack.c.bf16 (!%p963_p9), %v736_v48, %v735_v46  ;;  %v739_v53 = vld [vmem:[%s1719_s26 + $0xc0] sm:$0xff] (!%p963_p9)  ;;  %v741_v55 = vld [vmem:[%s1719_s26 + $0xd0] sm:$0xff] (!%p963_p9) }
 0x1af   : > { %v726_v32 = vld [vmem:[%s1719_s26 + $0x58] sm:$0xff] (!%p963_p9)  ;;  %777 = vst [vmem:[%s1892_s4 + $0x40] sm:$0xff] (!%p963_p9), %v755_v43  ;;  %v758_v52 = vpack.c.bf16 (!%p963_p9), %v738_v50, %v737_v49  ;;  %778 = vst [vmem:[%s1892_s4 + $0x48] sm:$0xff] (!%p963_p9), %v756_v47  ;;  %v759_v56 = vpack.c.bf16 (!%p963_p9), %v740_v54, %v739_v53 }
 0x1b0   : > { %692 = vst [vmem:[%s1719_s26 + $0x68] sm:$0xff] %v660_v59  ;;  %708 = vst [vmem:[%s1719_s26 + $0xe8] sm:$0xff] %v676_v60  ;;  %v1034_v61 = vpop.f32.mrb[28].mxu0  ;;  %v1082_v62 = vpop.f32.mrb[28].mxu1  ;;  %v752_v34 = vpack.c.bf16 (!%p963_p9), %v726_v32, %v725_v31  ;;  %v742_v57 = vld [vmem:[%s1719_s26 + $0xd8] sm:$0xff] (!%p963_p9) }
 0x1b1   : > { %v1035_v0 = vpop.f32.mrb[29].mxu0  ;;  %v1083_v2 = vpop.f32.mrb[29].mxu1  ;;  %779 = vst [vmem:[%s1892_s4 + $0x50] sm:$0xff] (!%p963_p9), %v757_v51  ;;  %780 = vst [vmem:[%s1892_s4 + $0x58] sm:$0xff] (!%p963_p9), %v758_v52  ;;  %v760_v60 = vpack.c.bf16 (!%p963_p9), %v742_v57, %v741_v55 }
 0x1b2   : > { %v1036_v3 = vadd.f32 %v1035_v0, %v1034_v61  ;;  %v1084_v4 = vadd.f32 %v1083_v2, %v1082_v62  ;;  %v1037_v5 = vpop.f32.mrb[30].mxu0  ;;  %v1085_v6 = vpop.f32.mrb[30].mxu1  ;;  %714 = sbr.rel (%p963_p9) target bundleno = 452 (0x1c4), region = 44  ;;  %774 = vst [vmem:[%s1892_s4 + $0x28] sm:$0xff] (!%p963_p9), %v752_v34  ;;  %781 = vst [vmem:[%s1892_s4 + $0x60] sm:$0xff] (!%p963_p9), %v759_v56 }
 0x1b3   : > { %v1038_v8 = vpop.f32.mrb[31].mxu0  ;;  %v1086_v10 = vpop.f32.mrb[31].mxu1  ;;  %782 = vst [vmem:[%s1892_s4 + $0x68] sm:$0xff] (!%p963_p9), %v760_v60 }
 0x1b4   : > { %v661_v11 = vadd.f32 %v1036_v3, %v255_v63  ;;  %v677_v12 = vadd.f32 %v1084_v4, %v271_v1  ;;  %v1039_v13 = vadd.f32 %v1038_v8, %v1037_v5  ;;  %v1087_v14 = vadd.f32 %v1086_v10, %v1085_v6 }
 0x1b5   : > { %v727_v35 = vld [vmem:[%s1719_s26 + $0x60] sm:$0xff] (!%p963_p9) }
 0x1b6   : > { %693 = vst [vmem:[%s1719_s26 + $0x70] sm:$0xff] %v661_v11  ;;  %709 = vst [vmem:[%s1719_s26 + $0xf0] sm:$0xff] %v677_v12  ;;  %v662_v15 = vadd.f32 %v1039_v13, %v256_v7  ;;  %v678_v16 = vadd.f32 %v1087_v14, %v272_v9  ;;  %v743_v58 = vld [vmem:[%s1719_s26 + $0xe0] sm:$0xff] (!%p963_p9) }
 0x1b7   : > { %v728_v36 = vld [vmem:[%s1719_s26 + $0x68] sm:$0xff] (!%p963_p9) }
 0x1b8   : > { %694 = vst [vmem:[%s1719_s26 + $0x78] sm:$0xff] %v662_v15  ;;  %710 = vst [vmem:[%s1719_s26 + $0xf8] sm:$0xff] %v678_v16  ;;  %v753_v38 = vpack.c.bf16 (!%p963_p9), %v728_v36, %v727_v35  ;;  %v744_v59 = vld [vmem:[%s1719_s26 + $0xe8] sm:$0xff] (!%p963_p9) }
 0x1b9   : > { %v761_v61 = vpack.c.bf16 %v744_v59, %v743_v58 }
 0x1ba   : > { %775 = vst [vmem:[%s1892_s4 + $0x30] sm:$0xff] %v753_v38 }
 0x1bb   : > { %783 = vst [vmem:[%s1892_s4 + $0x70] sm:$0xff] %v761_v61 }
 0x1bd   : > { %v729_v37 = vld [vmem:[%s1719_s26 + $0x70] sm:$0xff] }
 0x1be   : > { %v745_v62 = vld [vmem:[%s1719_s26 + $0xf0] sm:$0xff] }
 0x1bf   : > { %v730_v39 = vld [vmem:[%s1719_s26 + $0x78] sm:$0xff] }
 0x1c0   : > { %v754_v42 = vpack.c.bf16 %v730_v39, %v729_v37  ;;  %v746_v63 = vld [vmem:[%s1719_s26 + $0xf8] sm:$0xff] }
 0x1c1   : > { %v762_v0 = vpack.c.bf16 %v746_v63, %v745_v62 }
 0x1c2   : > { %776 = vst [vmem:[%s1892_s4 + $0x38] sm:$0xff] %v754_v42 }
 0x1c3   : > { %784 = vst [vmem:[%s1892_s4 + $0x78] sm:$0xff] %v762_v0 }
 0x1c4 PF: > { %s968_s24 = sshll.u32 %s1462_s16, 7  ;;  %s802_s3 = sshll.u32 %s1719_s26, 4  ;;  %s1930_s3 = int_to_ptr.vmem [resolvable:$true] %s802_s3 }
 0x1c5   : > { %s864_s7 = sadd.s32 %s1466_s17, %s968_s24  ;;  %s1939_s12 = scalar_lea.sflag [#allocation6], %s161_s30 }
 0x1c6   : > { %s969_s5 = sshll.u32 %s864_s7, 7  ;;  %s1339_s15 = scalar_lea.vmem %s1930_s3, 4096 }
 0x1c7   : > { %s866_s29 = scalar_lea.hbm %s2013_s2, %s969_s5  ;;  %p1340_p11 = scmp.ne.s32.totalorder %s1930_s3, %s1339_s15 }
 0x1c8   : > { %s1935_s8 = scalar_lea.hbm %s866_s29, 128  ;;  %p2031_p12 = scmp.ne.s32.totalorder %s2026_s28, 0 }
 0x1c9   : > { %s1490_s16 = smov [#allocation7]  }
 0x1ca   : > { %p1341_p8 = pnand %p1340_p11, %p2031_p12  ;;  %s1343_s17 = sshll.u32 %s1490_s16, 4  ;;  %s1344_s17 = int_to_ptr.vmem [resolvable:$false] %s1343_s17 }
 0x1cb   : > { %s1345_s26 = scalar_lea.vmem %s1344_s17, 8192  ;;  %p1346_p13 = scmp.lt.s32.totalorder %s1930_s3, %s1344_s17 }
 0x1cc   : > { %p1342_p10 = pneg %p1341_p8  ;;  %p1347_p0 = scmp.lt.s32.totalorder %s1345_s26, %s1339_s15 }
 0x1ce   : > { %p1348_p2 = por %p1347_p0, %p1346_p13 }
 0x1d0   : > { %p1349_p4 = pnand %p1348_p2, %p1342_p10 }
 0x1d2   : > { %1352 = shalt.err (!%p1349_p4)
}
 0x1d3   : > { %s1367_s23 = scalar_lea.hbm %s866_s29, 4224  ;;  %s1357_s4 = scalar_lea.hbm %s2013_s2, 32768 }
 0x1d4   : > { %p1354_p7 = scmp.ne.s32.totalorder %s1935_s8, %s1367_s23  ;;  %p1358_p6 = scmp.lt.u32.totalorder %s1935_s8, %s2013_s2 }
 0x1d5   : > { %p1359_p5 = scmp.lt.u32.totalorder %s1357_s4, %s1367_s23  ;;  %p1361_p11 = scmp.lt.u32.totalorder %s1367_s23, %s1935_s8 }
 0x1d6   : > { %p1355_p1 = pnand %p1354_p7, %p2031_p12 }
 0x1d7   : > { %p1360_p9 = por %p1359_p5, %p1358_p6 }
 0x1d8   : > { %p1356_p3 = pneg %p1355_p1 }
 0x1d9   : > { %p1362_p8 = por %p1361_p11, %p1360_p9 }
 0x1db   : > { %p1363_p10 = pnand %p1362_p8, %p1356_p3 }
 0x1dd   : > { %1366 = shalt.err (!%p1363_p10)
}
 0x1de   : > { %s1491_s5 = smov 128   ;;  %s1492_s6 = smov 512  }
 0x1df   : > { %s1493_s22 = smov 8  }
 0x1e0   : > { %1109 = dma.vmem_to_hbm [thread:$0]  (%p2031_p12), %s1930_s3, 4096, %s1935_s8, %s1939_s12, %s1491_s5, %s1492_s6, %s1493_s22  }
 0x1e1 PF: > { %p1120_p13 = scmp.ge.s32.totalorder %s1482_s21, 2  ;;  %s817_s29 = sand.u32 1, %s1434_s9  }
 0x1e2   : > { %p2032_p0 = scmp.ne.s32.totalorder %s2028_s27, 0  ;;  %s818_s15 = scalar_lea.sflag [#allocation6], %s817_s29 }
 0x1e4   : > { %p1116_p2 = pnand %p1120_p13, %p2032_p0 }
 0x1e6   : > { %1429 = dma.done.wait (!%p1116_p2), %s818_s15, 4096  }
 0x1e7   : > { %1431 = vsyncadd (!%p1116_p2), %s818_s15, 4294963200  ;;  %s18_s21 = sadd.s32 1, %s1482_s21   ;;  %s2034_s28 = sld [smem:[#allocation19_spill]] }
 0x1e8   : > { %p1967_p4 = scmp.ge.s32.totalorder %s18_s21, 14   ;;  %s2035_s17 = sld [smem:[#allocation15_spill]] }
 0x1e9   : > { %s2036_s27 = sld [smem:[#allocation16_spill]]  ;;  %s2037_s3 = sld [smem:[#allocation17_spill]] }
 0x1ea   : > { %s2038_s20 = sld [smem:[#allocation18_spill]]  ;;  %s2040_s9 = smov %s1438_s10 }
 0x1eb   : > { %s2041_s10 = smov %s1442_s11  ;;  %s2042_s11 = smov %s1625_s25 }
 0x1ec   : > { %s2043_s12 = smov %s1450_s13  ;;  %s2044_s13 = smov %s1454_s14 }
 0x1ed   : > { %s2045_s14 = smov %s2034_s28  ;;  %s2046_s15 = smov %s1470_s18 }
 0x1ee   : > { %s2047_s16 = smov %s1474_s19  ;;  %17 = sbr.rel (!%p1967_p4) target bundleno = 10 (0xa), region = 87 }
 0x1ef   : > { %s2048_s18 = smov %s2036_s27  ;;  %s2049_s19 = smov %s2037_s3 }
 0x1f5   :  { %823 = vsyncpa [#allocation5], 1 }
 0x1f6   :  { %825 = vsyncpa [#allocation5 + $0x1], 1 }
 0x1f7   :  { %826 = vsyncpa [#allocation6], 1 }
 0x1f8   :  { %828 = vsyncpa [#allocation6 + $0x1], 1 }
 0x1f9   :  { %829 = vsyncmov [#allocation3] }
 0x1fc   :  { %s830_s25 = vpop.sfrf %829 }
 0x1fd   :  { %p972_p12 = scmp.ne.s32.totalorder %s830_s25, 0 }
 0x1ff   :  { %834 = shalt.err (%p972_p12)  }

</bundles_post_ra>
